<compile_context>
chip_gen: v7x
topology: tpu7x:2x2x1
jax: 0.10.0
libtpu: 0.0.40
codegen_flags: <defaults>
</compile_context>

<pallas_src>
import jax
import jax.numpy as jnp
from jax.experimental import pallas as pl
from jax.experimental.pallas import tpu as pltpu


def _round_up(x, m):
    return ((x + m - 1) // m) * m


def _pick_block_rows(n, block_n):
    """Batch-tile rows: multiple of 8, <= block_n, and (when n allows) an even
    number of grid steps so both v7x TensorCores get work."""
    pairs = max(1, -(-n // (2 * block_n)))   # ceil(n / (2*block_n))
    bt = -(-n // (2 * pairs))                # ceil(n / (2*pairs))
    bt = _round_up(max(bt, 1), 8)
    return max(8, min(bt, block_n, _round_up(n, 8)))


def cnn_text_kernel(tgt_ref, u_ref, bconv_ref, mask_ref, fcw_ref, fcb_ref, out_ref):
    # tgt_ref  : (Bt*W, Kmax) int32 -- col k = token id at position p+k, offset by k*Vp
    # u_ref    : (Kmax*Vp, Fp) bf16 -- embedding table folded into per-tap conv weights
    # bconv_ref: (1, Fp) f32;  mask_ref: (W, Fp) f32 valid-time mask
    # fcw_ref  : (Fp, Cp) bf16; fcb_ref: (1, Cp) f32
    # out_ref  : (Bt, Cp) f32 (lane-dense)
    BtW, Kmax = tgt_ref.shape
    KVp, Fp = u_ref.shape
    W = mask_ref.shape[0]
    Bt = BtW // W

    tgt = tgt_ref[...]                                              # (Bt*W, Kmax)
    lane = jax.lax.broadcasted_iota(jnp.int32, (BtW, KVp), 1)
    # Multi-hot row: Kmax hot lanes per output row (tap k lives in lanes [k*Vp, (k+1)*Vp)).
    hit = lane == tgt[:, 0:1]
    for k in range(1, Kmax):                                        # static unroll (Kmax=3)
        hit = hit | (lane == tgt[:, k:k + 1])
    multihot = jnp.where(hit, 1.0, 0.0).astype(jnp.bfloat16)        # (Bt*W, Kmax*Vp)

    # One long-K MXU matmul == embedding gather + all conv taps of all K-groups.
    acc = jnp.dot(multihot, u_ref[...], preferred_element_type=jnp.float32)   # (Bt*W, Fp)
    acc = jnp.maximum(acc + bconv_ref[...], 0.0)                    # bias + ReLU
    # Zero-masking invalid positions is valid ONLY because ReLU precedes it
    # (all valid values are >= 0, so the injected zeros never win the max).
    acc = acc.reshape(Bt, W, Fp) * mask_ref[...]
    feat = jnp.max(acc, axis=1)                                     # max-over-time -> (Bt, Fp)

    # dropout(p=0.2) is identity at inference.
    logits = jnp.dot(feat.astype(jnp.bfloat16), fcw_ref[...],
                     preferred_element_type=jnp.float32) + fcb_ref[...]
    out_ref[...] = logits


def cnn_text_forward(tokens, embed, w1, b1, w2, b2, w3, b3, fc_w, fc_b, *, block_n=256):
    N, W = tokens.shape
    V, D = embed.shape
    Co = w1.shape[-1]
    C = fc_w.shape[-1]
    ws, bs = (w1, w2, w3), (b1, b2, b3)
    Ks = tuple(int(w.shape[0]) for w in ws)
    Kmax = max(Ks)
    F = len(ws) * Co

    Vp = _round_up(V, 128)
    Fp = _round_up(F, 128)
    Cp = _round_up(C, 128)
    Bt = _pick_block_rows(N, block_n)         # batch tile (multiple of 8, >=2 grid steps if possible)
    Npad = _round_up(N, Bt)

    # ---- fold the embedding into the conv weights and pack lane-dense (VMEM resident) ----
    embed_f32 = embed.astype(jnp.float32)
    U = jnp.zeros((Kmax * Vp, Fp), jnp.float32)
    bconv = jnp.zeros((1, Fp), jnp.float32)
    klen = jnp.full((Fp,), W + Kmax, jnp.int32)            # padded cols -> never valid
    col = 0
    for w, b, K in zip(ws, bs, Ks):
        for k in range(K):
            U = U.at[k * Vp:k * Vp + V, col:col + Co].set(embed_f32 @ w[k].astype(jnp.float32))
        bconv = bconv.at[:, col:col + Co].set(b.reshape(1, Co).astype(jnp.float32))
        klen = klen.at[col:col + Co].set(K)
        col += Co
    U = U.astype(jnp.bfloat16)

    # position p is valid for a K-column iff p <= W - K
    mask = (jnp.arange(W)[:, None] <= (W - klen)[None, :]).astype(jnp.float32)   # (W, Fp)

    fcw_p = jnp.zeros((Fp, Cp), jnp.float32).at[:F, :C].set(
        fc_w.astype(jnp.float32)).astype(jnp.bfloat16)
    fcb_p = jnp.zeros((1, Cp), jnp.float32).at[:, :C].set(
        fc_b.reshape(1, C).astype(jnp.float32))

    # ---- tokens: pad batch, pre-unfold the Kmax taps on the indices (cheap int ops),
    # and pre-add the per-tap lane offset k*Vp so the kernel builds one multi-hot.
    # Clamped out-of-range taps only touch zero weight columns or masked positions. ----
    tok_pad = jnp.zeros((Npad, W), jnp.int32).at[:N].set(tokens.astype(jnp.int32))
    offs = jnp.minimum(jnp.arange(W)[:, None] + jnp.arange(Kmax)[None, :], W - 1)    # (W, Kmax)
    tgt = tok_pad[:, offs] + (jnp.arange(Kmax, dtype=jnp.int32) * Vp)[None, None, :]
    tgt = tgt.reshape(Npad * W, Kmax)

    out = pl.pallas_call(
        cnn_text_kernel,
        out_shape=jax.ShapeDtypeStruct((Npad, Cp), jnp.float32),
        grid=(Npad // Bt,),
        in_specs=[
            pl.BlockSpec((Bt * W, Kmax), lambda i: (i, 0)),      # token taps (per-tile)
            pl.BlockSpec((Kmax * Vp, Fp), lambda i: (0, 0)),     # folded embed+conv weights
            pl.BlockSpec((1, Fp),        lambda i: (0, 0)),      # packed conv bias
            pl.BlockSpec((W, Fp),        lambda i: (0, 0)),      # valid-time mask
            pl.BlockSpec((Fp, Cp),       lambda i: (0, 0)),      # fc weight (bf16, padded)
            pl.BlockSpec((1, Cp),        lambda i: (0, 0)),      # fc bias (padded)
        ],
        out_specs=pl.BlockSpec((Bt, Cp), lambda i: (i, 0)),      # lane-dense output
        compiler_params=pltpu.CompilerParams(
            dimension_semantics=("parallel",),
            vmem_limit_bytes=32 * 1024 * 1024),
    )(tgt, U, bconv, mask, fcw_p, fcb_p)
    return out[:N, :C]


def ref_forward(tokens, embed, w1, b1, w2, b2, w3, b3, fc_w, fc_b):
    """Pure-JAX reference mirroring the PyTorch forward (eval mode)."""
    emb = embed[tokens].astype(jnp.float32)        # (N, W, D)
    W = emb.shape[1]
    feats = []
    for w, b in ((w1, b1), (w2, b2), (w3, b3)):
        K = w.shape[0]
        L = W - K + 1
        acc = sum(jnp.einsum('nld,dc->nlc', emb[:, k:k + L, :],
                             w[k].astype(jnp.float32)) for k in range(K)) + b
        acc = jnp.maximum(acc, 0.0)
        feats.append(jnp.max(acc, axis=1))
    feat = jnp.concatenate(feats, axis=1)
    return feat @ fc_w + fc_b


if __name__ == "__main__":
    V = 100      # embed_num (vocab)
    Cnum = 5     # class_num
    N = 2        # batch
    W = 8        # sequence length
    D = 170      # embedding dim (fixed in the PyTorch module)
    Co = 40      # conv output channels

    key = jax.random.PRNGKey(0)
    ks = jax.random.split(key, 10)

    def bf16_round(x):   # params the kernel stores/uses in bf16 -> round once for both paths
        return x.astype(jnp.bfloat16).astype(jnp.float32)

    embed = bf16_round(0.1 * jax.random.normal(ks[0], (V, D), jnp.float32))   # nn.Embedding(V, D)
    # Conv2d(1, Co, (K, D)) weights stored as (K, D, Co) = weight[:, 0, k, :].T per tap
    w1 = bf16_round(0.05 * jax.random.normal(ks[1], (1, D, Co), jnp.float32))
    b1 = 0.01 * jax.random.normal(ks[2], (1, Co), jnp.float32)
    w2 = bf16_round(0.05 * jax.random.normal(ks[3], (2, D, Co), jnp.float32))
    b2 = 0.01 * jax.random.normal(ks[4], (1, Co), jnp.float32)
    w3 = bf16_round(0.05 * jax.random.normal(ks[5], (3, D, Co), jnp.float32))
    b3 = 0.01 * jax.random.normal(ks[6], (1, Co), jnp.float32)
    fc_w = bf16_round(0.05 * jax.random.normal(ks[7], (3 * Co, Cnum), jnp.float32))  # Linear(120, C)
    fc_b = 0.01 * jax.random.normal(ks[8], (1, Cnum), jnp.float32)
    tokens = jax.random.randint(ks[9], (N, W), 0, V, dtype=jnp.int32)

    logits = cnn_text_forward(tokens, embed, w1, b1, w2, b2, w3, b3, fc_w, fc_b)
    jax.block_until_ready(logits)
    assert logits.shape == (N, Cnum)

    ref = ref_forward(tokens, embed, w1, b1, w2, b2, w3, b3, fc_w, fc_b)
    # bf16 storage of the folded conv weights / fc weights and the bf16 fc input cast
    # introduce ~1e-4-level deltas vs the f32 reference head.
    assert jnp.allclose(logits, ref, atol=2e-3, rtol=2e-3), "mismatch vs reference"

    print("KERNEL_OK")
</pallas_src>

<mosaic_0001>
module attributes {stable_mosaic.version = 11 : i64} {
  func.func @cnn_text_kernel(%arg0: i32, %arg1: memref<64x3xi32, #tpu.memory_space<vmem>>, %arg2: memref<384x128xbf16, #tpu.memory_space<vmem>>, %arg3: memref<1x128xf32, #tpu.memory_space<vmem>>, %arg4: memref<8x128xf32, #tpu.memory_space<vmem>>, %arg5: memref<128x128xbf16, #tpu.memory_space<vmem>>, %arg6: memref<1x128xf32, #tpu.memory_space<vmem>>, %arg7: memref<8x128xf32, #tpu.memory_space<vmem>>) attributes {dimension_semantics = [#tpu.dimension_semantics<parallel>], iteration_bounds = array<i64: 1>, scalar_prefetch = 0 : i64, scratch_operands = 0 : i64, tpu.core_type = #tpu.core_type<tc>, window_params = [{transform_indices = @transform_0, window_bounds = array<i64: 64, 3>}, {pipeline_mode = #tpu.pipeline_mode<synchronous>, transform_indices = @transform_1, window_bounds = array<i64: 384, 128>}, {pipeline_mode = #tpu.pipeline_mode<synchronous>, transform_indices = @transform_2, window_bounds = array<i64: 1, 128>}, {pipeline_mode = #tpu.pipeline_mode<synchronous>, transform_indices = @transform_3, window_bounds = array<i64: 8, 128>}, {pipeline_mode = #tpu.pipeline_mode<synchronous>, transform_indices = @transform_4, window_bounds = array<i64: 128, 128>}, {pipeline_mode = #tpu.pipeline_mode<synchronous>, transform_indices = @transform_5, window_bounds = array<i64: 1, 128>}, {transform_indices = @transform_6, window_bounds = array<i64: 8, 128>}]} {
    %c0 = arith.constant 0 : index
    %c0_0 = arith.constant 0 : index
    %0 = vector.load %arg1[%c0, %c0_0] : memref<64x3xi32, #tpu.memory_space<vmem>>, vector<64x3xi32>
    %1 = tpu.iota {dimensions = array<i32: 1>} : vector<64x384xi32>
    %2 = vector.extract_strided_slice %0 {offsets = [0, 0], sizes = [64, 1], strides = [1, 1]} : vector<64x3xi32> to vector<64x1xi32>
    %3 = vector.broadcast %2 : vector<64x1xi32> to vector<64x384xi32>
    %4 = arith.cmpi eq, %1, %3 : vector<64x384xi32>
    %5 = vector.extract_strided_slice %0 {offsets = [0, 1], sizes = [64, 1], strides = [1, 1]} : vector<64x3xi32> to vector<64x1xi32>
    %6 = vector.broadcast %5 : vector<64x1xi32> to vector<64x384xi32>
    %7 = arith.cmpi eq, %1, %6 : vector<64x384xi32>
    %8 = arith.ori %4, %7 : vector<64x384xi1>
    %9 = vector.extract_strided_slice %0 {offsets = [0, 2], sizes = [64, 1], strides = [1, 1]} : vector<64x3xi32> to vector<64x1xi32>
    %10 = vector.broadcast %9 : vector<64x1xi32> to vector<64x384xi32>
    %11 = arith.cmpi eq, %1, %10 : vector<64x384xi32>
    %12 = arith.ori %8, %11 : vector<64x384xi1>
    %cst = arith.constant 1.000000e+00 : f32
    %cst_1 = arith.constant 0.000000e+00 : f32
    %13 = vector.broadcast %cst : f32 to vector<64x384xf32>
    %14 = vector.broadcast %cst_1 : f32 to vector<64x384xf32>
    %15 = arith.select %12, %13, %14 : vector<64x384xi1>, vector<64x384xf32>
    %16 = arith.truncf %15 : vector<64x384xf32> to vector<64x384xbf16>
    %c0_2 = arith.constant 0 : index
    %c0_3 = arith.constant 0 : index
    %17 = vector.load %arg2[%c0_2, %c0_3] : memref<384x128xbf16, #tpu.memory_space<vmem>>, vector<384x128xbf16>
    %cst_4 = arith.constant dense<0.000000e+00> : vector<64x128xf32>
    %18 = tpu.matmul %16, %17, %cst_4 {dimension_numbers = #tpu.dot_dimension_numbers<[1], [0], [0], [1], [0, 0, 1, 1], [], []>} : vector<64x384xbf16>, vector<384x128xbf16>, vector<64x128xf32> -> vector<64x128xf32>
    %c0_5 = arith.constant 0 : index
    %c0_6 = arith.constant 0 : index
    %19 = vector.load %arg3[%c0_5, %c0_6] : memref<1x128xf32, #tpu.memory_space<vmem>>, vector<1x128xf32>
    %20 = vector.broadcast %19 : vector<1x128xf32> to vector<64x128xf32>
    %21 = arith.addf %18, %20 : vector<64x128xf32>
    %cst_7 = arith.constant 0.000000e+00 : f32
    %22 = vector.broadcast %cst_7 : f32 to vector<64x128xf32>
    %23 = arith.maximumf %21, %22 : vector<64x128xf32>
    %24 = vector.shape_cast %23 : vector<64x128xf32> to vector<8x8x128xf32>
    %c0_8 = arith.constant 0 : index
    %c0_9 = arith.constant 0 : index
    %25 = vector.load %arg4[%c0_8, %c0_9] : memref<8x128xf32, #tpu.memory_space<vmem>>, vector<8x128xf32>
    %26 = vector.shape_cast %25 : vector<8x128xf32> to vector<1x8x128xf32>
    %27 = vector.broadcast %26 : vector<1x8x128xf32> to vector<8x8x128xf32>
    %28 = arith.mulf %24, %27 : vector<8x8x128xf32>
    %cst_10 = arith.constant dense<0xFF800000> : vector<8x128xf32>
    %29 = vector.multi_reduction <maximumf>, %28, %cst_10 [1] : vector<8x8x128xf32> to vector<8x128xf32>
    %30 = arith.truncf %29 : vector<8x128xf32> to vector<8x128xbf16>
    %c0_11 = arith.constant 0 : index
    %c0_12 = arith.constant 0 : index
    %31 = vector.load %arg5[%c0_11, %c0_12] : memref<128x128xbf16, #tpu.memory_space<vmem>>, vector<128x128xbf16>
    %cst_13 = arith.constant dense<0.000000e+00> : vector<8x128xf32>
    %32 = tpu.matmul %30, %31, %cst_13 {dimension_numbers = #tpu.dot_dimension_numbers<[1], [0], [0], [1], [0, 0, 1, 1], [], []>} : vector<8x128xbf16>, vector<128x128xbf16>, vector<8x128xf32> -> vector<8x128xf32>
    %c0_14 = arith.constant 0 : index
    %c0_15 = arith.constant 0 : index
    %33 = vector.load %arg6[%c0_14, %c0_15] : memref<1x128xf32, #tpu.memory_space<vmem>>, vector<1x128xf32>
    %34 = vector.broadcast %33 : vector<1x128xf32> to vector<8x128xf32>
    %35 = arith.addf %32, %34 : vector<8x128xf32>
    %c0_16 = arith.constant 0 : index
    %c0_17 = arith.constant 0 : index
    %36 = vector.load %arg7[%c0_16, %c0_17] : memref<8x128xf32, #tpu.memory_space<vmem>>, vector<8x128xf32>
    tpu.vector_store %arg7[%c0_16, %c0_17], %35 {strides = array<i32>} : memref<8x128xf32, #tpu.memory_space<vmem>>, vector<8x128xf32>,
    return
  }
  func.func @transform_0(%arg0: i32) -> (i32, i32) {
    %c0_i32 = arith.constant 0 : i32
    %c0_i32_0 = arith.constant 0 : i32
    return %arg0, %c0_i32 : i32, i32
  }
  func.func @transform_1(%arg0: i32) -> (i32, i32) {
    %c0_i32 = arith.constant 0 : i32
    %c0_i32_0 = arith.constant 0 : i32
    %c0_i32_1 = arith.constant 0 : i32
    return %c0_i32, %c0_i32_0 : i32, i32
  }
  func.func @transform_2(%arg0: i32) -> (i32, i32) {
    %c0_i32 = arith.constant 0 : i32
    %c0_i32_0 = arith.constant 0 : i32
    %c0_i32_1 = arith.constant 0 : i32
    return %c0_i32, %c0_i32_0 : i32, i32
  }
  func.func @transform_3(%arg0: i32) -> (i32, i32) {
    %c0_i32 = arith.constant 0 : i32
    %c0_i32_0 = arith.constant 0 : i32
    %c0_i32_1 = arith.constant 0 : i32
    return %c0_i32, %c0_i32_0 : i32, i32
  }
  func.func @transform_4(%arg0: i32) -> (i32, i32) {
    %c0_i32 = arith.constant 0 : i32
    %c0_i32_0 = arith.constant 0 : i32
    %c0_i32_1 = arith.constant 0 : i32
    return %c0_i32, %c0_i32_0 : i32, i32
  }
  func.func @transform_5(%arg0: i32) -> (i32, i32) {
    %c0_i32 = arith.constant 0 : i32
    %c0_i32_0 = arith.constant 0 : i32
    %c0_i32_1 = arith.constant 0 : i32
    return %c0_i32, %c0_i32_0 : i32, i32
  }
  func.func @transform_6(%arg0: i32) -> (i32, i32) {
    %c0_i32 = arith.constant 0 : i32
    %c0_i32_0 = arith.constant 0 : i32
    return %arg0, %c0_i32 : i32, i32
  }
}

</mosaic_0001>

<bundles_post_ra>
// kernel: tpu_custom_call.1
= control target key start
LH: loop header
LB: loop body
LE: loop exit
PB: predicated region body
PF: predicated region fallthrough
CT: control target
= control target key end

     0   :  { %11 = vsyncpa [#allocation3], 0  ;;  %s1427_s0 = inlined_call_operand.vmem [shape: s32[64,3], index: 0, kind: input, shape index: {}]   ;;  %s1428_s1 = inlined_call_operand.hbm [shape: bf16[384,128], index: 1, kind: input, shape index: {}]   ;;  %s1429_s2 = inlined_call_operand.vmem [shape: f32[1,128], index: 2, kind: input, shape index: {}]   ;;  %s1430_s3 = inlined_call_operand.vmem [shape: f32[8,128], index: 3, kind: input, shape index: {}]   ;;  %s1431_s4 = inlined_call_operand.vmem [shape: bf16[128,128], index: 4, kind: input, shape index: {}]   ;;  %s1432_s5 = inlined_call_operand.vmem [shape: f32[1,128], index: 5, kind: input, shape index: {}]   ;;  %s1433_s6 = inlined_call_operand.hbm [shape: f32[8,128], index: 6, kind: output, shape index: {}]  }
   0x1   :  { %12 = vsyncpa [#allocation4], 0  ;;  %s1108_s21 = smov [#allocation2]   ;;  %s1060_s25 = scalar_lea.hbm %s1428_s1, 3072 }
   0x2   :  { %s20_s22 = sshll.u32 %s1108_s21, 4  ;;  %p1061_p0 = scmp.ne.s32.totalorder %s1428_s1, %s1060_s25  ;;  %s21_s22 = int_to_ptr.vmem [resolvable:$true] %s20_s22 }
   0x3   :  { %p1064_p1 = scmp.lt.u32.totalorder %s1060_s25, %s1428_s1 }
   0x5   :  { %p1066_p2 = pnand %p1064_p1, %p1061_p0 }
   0x7   :  { %1069 = shalt.err (!%p1066_p2)
}
   0x8   :  { %s1070_s30 = scalar_lea.vmem %s21_s22, 3072  ;;  %p1075_p4 = scmp.lt.s32.totalorder %s21_s22, %s21_s22 }
   0x9   :  { %p1071_p3 = scmp.ne.s32.totalorder %s21_s22, %s1070_s30  ;;  %p1076_p5 = scmp.lt.s32.totalorder %s1070_s30, %s1070_s30 }
   0xb   :  { %p1077_p6 = por %p1076_p5, %p1075_p4 }
   0xd   :  { %p1078_p7 = pnand %p1077_p6, %p1071_p3 }
   0xf   :  { %1081 = shalt.err (!%p1078_p7)
}
  0x10   :  { %s1109_s7 = smov 64   ;;  %s1110_s8 = smov 4  }
  0x11   :  { %26 = dma.hbm_to_vmem [thread:$0]  %s1428_s1, 3072, %s21_s22, [#allocation3], %s1109_s7, %s1109_s7, %s1110_s8  }
  0x12   :  { %1104 = dma.done.wait [#allocation3], 3072  }
  0x13   :  { %1105 = vsyncadd [#allocation3], 4294964224  ;;  %v1111_v0 = vmov 1   ;;  %v1112_v1 = vmov 0   ;;  %v39_v2 = vld [vmem:[%s1427_s0] sm:$0xff]  ;;  %v40_v3 = vld [vmem:[%s1427_s0 + $0x8] sm:$0xff]  ;;  %v47_v35 = vlaneseq }
  0x14   :  { %1014 = vset.pattern.permute.xlu1 %v1111_v0  ;;  %1013 = vset.pattern.permute.xlu0 %v1112_v1  ;;  %v1028_v4 = vld [vmem:[#allocation2 + $0x40] sm:$0xff]   ;;  %v1030_v6 = vld [vmem:[#allocation2 + $0x48] sm:$0xff]   ;;  %v42_v7 = vld [vmem:[%s1427_s0 + $0x18] sm:$0xff]  ;;  %v1113_v10 = vmov 2   ;;  %v1434_v43 = vmov 0  ;;  %v1436_v45 = vmov 0 }
  0x15   :  { %100 = vperm.xlu1 %1014, %v39_v2   ;;  %52 = vperm.xlu0 %1013, %v39_v2   ;;  %v1029_v5 = vld [vmem:[#allocation2] sm:$0xff]   ;;  %v1031_v8 = vld [vmem:[#allocation2 + $0x8] sm:$0xff]   ;;  %v1032_v9 = vld [vmem:[#allocation2 + $0x50] sm:$0xff]   ;;  %v1204_v36 = vand.u32 127, %v47_v35  ;;  %v1438_v47 = vmov 0  ;;  %v1445_v54 = vmov 0 }
  0x16   :  { %898 = vmatprep.subr.bf16.mxu0 %v1028_v4  ;;  %v41_v11 = vld [vmem:[%s1427_s0 + $0x10] sm:$0xff]  ;;  %v1036_v13 = vld [vmem:[#allocation2 + $0x80] sm:$0xff]   ;;  %v1034_v14 = vld [vmem:[#allocation2 + $0x58] sm:$0xff]   ;;  %v1114_v51 = vmov 1.0|1.0   ;;  %v1447_v56 = vmov 0 }
  0x17   :  { %899 = vmatpush3.bf16.msra.mxu0 %v1029_v5  ;;  %v1033_v12 = vld [vmem:[#allocation2 + $0x10] sm:$0xff]   ;;  %959 = vmatprep.subr.bf16.mxu1 %v1036_v13  ;;  %v1039_v15 = vld [vmem:[#allocation2 + $0x88] sm:$0xff]   ;;  %v1035_v16 = vld [vmem:[#allocation2 + $0x18] sm:$0xff]   ;;  %v1207_v39 = vadd.s32 128, %v1204_v36  ;;  %v1210_v40 = vadd.s32 256, %v1204_v36  ;;  %v1451_v62 = vmov 0 }
  0x18   :  { %900 = vmatprep.subr.bf16.mxu0 %v1030_v6  ;;  %960 = vmatpush3.bf16.msra.mxu1 %v1036_v13  ;;  %v1037_v17 = vld [vmem:[#allocation2 + $0x60] sm:$0xff]   ;;  %v1042_v18 = vld [vmem:[#allocation2 + $0x90] sm:$0xff]   ;;  %v1040_v20 = vld [vmem:[#allocation2 + $0x68] sm:$0xff]   ;;  %s1117_s19 = smov [#allocation5]  }
  0x19   :  { %103 = vperm.xlu1 %1014, %v40_v3   ;;  %55 = vperm.xlu0 %1013, %v40_v3   ;;  %v1038_v19 = vld [vmem:[#allocation2 + $0x20] sm:$0xff]   ;;  %v44_v22 = vld [vmem:[%s1427_s0 + $0x28] sm:$0xff]  ;;  %v1045_v23 = vld [vmem:[#allocation2 + $0x98] sm:$0xff]   ;;  %s831_s20 = sshll.u32 %s1117_s19, 4  ;;  %s832_s20 = int_to_ptr.vmem [resolvable:$true] %s831_s20 }
  0x1a   :  { %961 = vmatprep.subr.bf16.mxu1 %v1039_v15  ;;  %v43_v21 = vld [vmem:[%s1427_s0 + $0x20] sm:$0xff]  ;;  %v1041_v24 = vld [vmem:[#allocation2 + $0x28] sm:$0xff]   ;;  %v1043_v25 = vld [vmem:[#allocation2 + $0x70] sm:$0xff]   ;;  %s1082_s21 = scalar_lea.vmem %s832_s20, 128  ;;  %p1087_p9 = scmp.lt.s32.totalorder %s832_s20, %s832_s20 }
  0x1b   :  { %901 = vmatpush3.bf16.msra.mxu0 %v1031_v8  ;;  %v1044_v26 = vld [vmem:[#allocation2 + $0x30] sm:$0xff]   ;;  %v46_v27 = vld [vmem:[%s1427_s0 + $0x38] sm:$0xff]  ;;  %v1048_v28 = vld [vmem:[#allocation2 + $0xa0] sm:$0xff]   ;;  %v1459_v8 = vmov 0  ;;  %p1083_p8 = scmp.ne.s32.totalorder %s832_s20, %s1082_s21  ;;  %p1088_p10 = scmp.lt.s32.totalorder %s1082_s21, %s1082_s21 }
  0x1c   :  { %902 = vmatprep.subr.bf16.mxu0 %v1032_v9  ;;  %962 = vmatpush3.bf16.msra.mxu1 %v1039_v15  ;;  %v1046_v29 = vld [vmem:[#allocation2 + $0x78] sm:$0xff]   ;;  %v1049_v30 = vld [vmem:[#allocation2 + $0xa8] sm:$0xff]   ;;  %v1050_v32 = vld [vmem:[#allocation2 + $0xb0] sm:$0xff]   ;;  %v1461_v9 = vmov 0 }
  0x1d   :  { %1015 = vset.pattern.permute.xlu1 %v1113_v10  ;;  %61 = vperm.xlu0 %1013, %v42_v7   ;;  %v1047_v31 = vld [vmem:[#allocation2 + $0x38] sm:$0xff]   ;;  %v45_v33 = vld [vmem:[%s1427_s0 + $0x30] sm:$0xff]  ;;  %v1053_v13 = vld [vmem:[%s1431_s4 + $0x8] sm:$0xff]   ;;  %p1089_p11 = por %p1088_p10, %p1087_p9 }
  0x1e   :  { %175 = vperm.xlu1 %1015, %v40_v3   ;;  %963 = vmatprep.subr.bf16.mxu1 %v1042_v18  ;;  %v1051_v34 = vld [vmem:[#allocation2 + $0xb8] sm:$0xff]  }
  0x1f   :  { %903 = vmatpush3.bf16.msra.mxu0 %v1033_v12  ;;  %v1115_v12 = vmov 0.0   ;;  %v1055_v15 = vld [vmem:[%s1431_s4 + $0x18] sm:$0xff]   ;;  %p1090_p12 = pnand %p1089_p11, %p1083_p8 }
  0x20   :  { %904 = vmatprep.subr.bf16.mxu0 %v1034_v14  ;;  %964 = vmatpush3.bf16.msra.mxu1 %v1042_v18  ;;  %v1054_v14 = vld [vmem:[%s1431_s4 + $0x10] sm:$0xff]  }
  0x21   :  { %1017 = vset.pattern.permute.xlu0 %v1113_v10  ;;  %965 = vmatprep.subr.bf16.mxu1 %v1045_v23  ;;  %v1058_v18 = vld [vmem:[%s1431_s4 + $0x30] sm:$0xff]  }
  0x22   :  { %1016 = vset.pattern.permute.xlu1 %v1112_v1  ;;  %172 = vperm.xlu0 %1017, %v39_v2  }
  0x23   :  { %58 = vperm.xlu1 %1016, %v41_v11   ;;  %905 = vmatpush3.bf16.msra.mxu0 %v1035_v16  ;;  %v1056_v16 = vld [vmem:[%s1431_s4 + $0x20] sm:$0xff]  }
  0x24   :  { %906 = vmatprep.subr.bf16.mxu0 %v1037_v17  ;;  %966 = vmatpush3.bf16.msra.mxu1 %v1045_v23  ;;  %v1057_v17 = vld [vmem:[%s1431_s4 + $0x28] sm:$0xff]  }
  0x25   :  { %967 = vmatprep.subr.bf16.mxu1 %v1048_v28 }
  0x26   :  { %178 = vperm.xlu0 %1017, %v41_v11  }
  0x27   :  { %1018 = vset.pattern.permute.xlu1 %v1111_v0  ;;  %907 = vmatpush3.bf16.msra.mxu0 %v1038_v19  ;;  %v1059_v19 = vld [vmem:[%s1431_s4 + $0x38] sm:$0xff]  }
  0x28   :  { %106 = vperm.xlu1 %1018, %v41_v11   ;;  %908 = vmatprep.subr.bf16.mxu0 %v1040_v20  ;;  %v1052_v11 = vld [vmem:[%s1431_s4] sm:$0xff]  }
  0x29   :  { %968 = vmatpush3.bf16.msra.mxu1 %v1048_v28 }
  0x2a   :  { %184 = vperm.xlu0 %1017, %v43_v21   ;;  %969 = vmatprep.subr.bf16.mxu1 %v1049_v30 }
  0x2b   :  { %909 = vmatpush3.bf16.msra.mxu0 %v1041_v24 }
  0x2c   :  { %109 = vperm.xlu1 %1018, %v42_v7   ;;  %910 = vmatprep.subr.bf16.mxu0 %v1043_v25 }
  0x2d   :  { %970 = vmatpush3.bf16.msra.mxu1 %v1049_v30 }
  0x2e   :  { %1022 = vset.pattern.permute.xlu0 %v1112_v1  ;;  %971 = vmatprep.subr.bf16.mxu1 %v1050_v32 }
  0x2f   :  { %67 = vperm.xlu0 %1022, %v44_v22   ;;  %911 = vmatpush3.bf16.msra.mxu0 %v1044_v26  ;;  %v1389_v26 = vld [vmem:[%s1429_s2] ss:$0 sm:$0xff] }
  0x30   :  { %1019 = vset.pattern.permute.xlu1 %v1113_v10  ;;  %912 = vmatprep.subr.bf16.mxu0 %v1046_v29 }
  0x31   :  { %181 = vperm.xlu1 %1019, %v42_v7   ;;  %972 = vmatpush3.bf16.msra.mxu1 %v1050_v32  ;;  %v1457_v7 = vmov 0 }
  0x32   :  { %973 = vmatprep.subr.bf16.mxu1 %v1051_v34 }
  0x33   :  { %73 = vperm.xlu0 %1022, %v46_v27   ;;  %913 = vmatpush3.bf16.msra.mxu0 %v1047_v31 }
  0x34   :  { %983 = vmatprep.subr.bf16.mxu0 %v1115_v12 }
  0x35   :  { %1020 = vset.pattern.permute.xlu1 %v1112_v1  ;;  %974 = vmatpush3.bf16.msra.mxu1 %v1051_v34  ;;  %v1396_v34 = vld [vmem:[%s1430_s3] sm:$0xff] }
  0x36   :  { %64 = vperm.xlu1 %1020, %v43_v21  }
  0x37   :  { %1026 = vset.pattern.permute.xlu0 %v1113_v10 }
  0x38   :  { %190 = vperm.xlu0 %1026, %v45_v33  }
  0x3a   :  { %1021 = vset.pattern.permute.xlu1 %v1111_v0 }
  0x3b   :  { %112 = vperm.xlu1 %1021, %v43_v21  }
  0x3f   :  { %115 = vperm.xlu1 %1021, %v44_v22  }
  0x43   :  { %1023 = vset.pattern.permute.xlu1 %v1113_v10 }
  0x44   :  { %187 = vperm.xlu1 %1023, %v44_v22  }
  0x48   :  { %1024 = vset.pattern.permute.xlu1 %v1112_v1 }
  0x49   :  { %70 = vperm.xlu1 %1024, %v45_v33  }
  0x4d   :  { %1025 = vset.pattern.permute.xlu1 %v1111_v0  ;;  %v1453_v0 = vmov 0 }
  0x4e   :  { %118 = vperm.xlu1 %1025, %v45_v33  }
  0x52   :  { %121 = vperm.xlu1 %1025, %v46_v27  }
  0x56   :  { %1027 = vset.pattern.permute.xlu1 %v1113_v10 }
  0x57   :  { %193 = vperm.xlu1 %1027, %v46_v27  }
  0x94   :  { %v101_v37 = vpop.permute.xlu1 %100  ;;  %v53_v38 = vpop.permute.xlu0 %52 }
  0x95   :  { %vm76_vm0 = vcmp.eq.s32.totalorder %v1207_v39, %v53_v38  ;;  %vm124_vm1 = vcmp.eq.s32.totalorder %v1207_v39, %v101_v37  ;;  %vm77_vm2 = vcmp.eq.s32.totalorder %v1210_v40, %v53_v38  ;;  %vm125_vm3 = vcmp.eq.s32.totalorder %v1210_v40, %v101_v37 }
  0x96   :  { %vm123_vm6 = vcmp.eq.s32.totalorder %v1204_v36, %v101_v37  ;;  %vm75_vm7 = vcmp.eq.s32.totalorder %v1204_v36, %v53_v38  ;;  %vm1222_vm10 = vmor %vm76_vm0, %vm124_vm1 }
  0x97   :  { %v1435_v43 = vsel %vm1222_vm10, 4294967295, %v1434_v43  ;;  %vm1228_vm13 = vmor %vm77_vm2, %vm125_vm3 }
  0x98   :  { %v104_v41 = vpop.permute.xlu1 %103  ;;  %v56_v42 = vpop.permute.xlu0 %55  ;;  %v1437_v45 = vsel %vm1228_vm13, 4294967295, %v1436_v45  ;;  %vm1232_vm15 = vmor %vm75_vm7, %vm123_vm6 }
  0x99   :  { %vm126_vm4 = vcmp.eq.s32.totalorder %v1204_v36, %v104_v41  ;;  %vm78_vm5 = vcmp.eq.s32.totalorder %v1204_v36, %v56_v42  ;;  %vm79_vm8 = vcmp.eq.s32.totalorder %v1207_v39, %v56_v42  ;;  %vm127_vm9 = vcmp.eq.s32.totalorder %v1207_v39, %v104_v41 }
  0x9a   :  { %vm80_vm11 = vcmp.eq.s32.totalorder %v1210_v40, %v56_v42  ;;  %vm128_vm12 = vcmp.eq.s32.totalorder %v1210_v40, %v104_v41  ;;  %vm150_vm14 = vmor %vm78_vm5, %vm126_vm4  ;;  %v1439_v47 = vsel %vm1232_vm15, 4294967295, %v1438_v47 }
  0x9b   :  { %vm151_vm0 = vmor %vm79_vm8, %vm127_vm9  ;;  %vm1442_vm8 = vnez %v1435_v43 }
  0x9c   :  { %v62_v44 = vpop.permute.xlu0 %61  ;;  %vm152_vm3 = vmor %vm80_vm11, %vm128_vm12 }
  0x9d   :  { %v176_v46 = vpop.permute.xlu1 %175 }
  0x9e   :  { %vm199_vm1 = vcmp.eq.s32.totalorder %v1207_v39, %v176_v46  ;;  %vm200_vm10 = vcmp.eq.s32.totalorder %v1210_v40, %v176_v46  ;;  %vm198_vm2 = vcmp.eq.s32.totalorder %v1204_v36, %v176_v46 }
  0x9f   :  { %vm223_vm13 = vmor %vm151_vm0, %vm199_vm1 }
  0xa0   :  { %vm224_vm4 = vmor %vm152_vm3, %vm200_vm10  ;;  %vm1443_vm10 = vnez %v1437_v45 }
  0xa1   :  { %v173_v48 = vpop.permute.xlu0 %172  ;;  %vm1241_vm7 = vmor %vm150_vm14, %vm198_vm2  ;;  %vm1444_vm14 = vnez %v1439_v47 }
  0xa2   :  { %v59_v49 = vpop.permute.xlu1 %58  ;;  %vm196_vm5 = vcmp.eq.s32.totalorder %v1207_v39, %v173_v48  ;;  %vm197_vm6 = vcmp.eq.s32.totalorder %v1210_v40, %v173_v48  ;;  %vm195_vm15 = vcmp.eq.s32.totalorder %v1204_v36, %v173_v48 }
  0xa3   :  { %vm220_vm9 = vmor %vm1442_vm8, %vm196_vm5  ;;  %vm81_vm2 = vcmp.eq.s32.totalorder %v1204_v36, %v59_v49 }
  0xa4   :  { %vm865_vm11 = vmpackc.low %vm223_vm13, %vm220_vm9  ;;  %vm84_vm9 = vcmp.eq.s32.totalorder %v1204_v36, %v62_v44 }
  0xa5   :  { %866 = vmatprep.mubr.msk.bf16.mxu0 %vm865_vm11, %v1114_v51  ;;  %vm221_vm12 = vmor %vm1443_vm10, %vm197_vm6  ;;  %v179_v52 = vpop.permute.xlu0 %178  ;;  %vm85_vm10 = vcmp.eq.s32.totalorder %v1207_v39, %v62_v44 }
  0xa6   :  { %vm881_vm0 = vmpackc.low %vm224_vm4, %vm221_vm12  ;;  %vm82_vm4 = vcmp.eq.s32.totalorder %v1207_v39, %v59_v49 }
  0xa7   :  { %975 = vmatprep.mubr.msk.bf16.mxu1 %vm881_vm0, %v1114_v51  ;;  %vm219_vm1 = vmor %vm1444_vm14, %vm195_vm15  ;;  %v107_v53 = vpop.permute.xlu1 %106  ;;  %vm202_vm15 = vcmp.eq.s32.totalorder %v1207_v39, %v179_v52  ;;  %vm86_vm0 = vcmp.eq.s32.totalorder %v1210_v40, %v62_v44 }
  0xa8   :  { %vm867_vm3 = vmpackc.low %vm1241_vm7, %vm219_vm1  ;;  %vm129_vm13 = vcmp.eq.s32.totalorder %v1204_v36, %v107_v53  ;;  %vm130_vm5 = vcmp.eq.s32.totalorder %v1207_v39, %v107_v53  ;;  %vm131_vm8 = vcmp.eq.s32.totalorder %v1210_v40, %v107_v53  ;;  %vm83_vm7 = vcmp.eq.s32.totalorder %v1210_v40, %v59_v49 }
  0xa9   :  { %868 = vmatmul.mubr.msk.bf16.vlgmr.msra.gmra.mrb[0].mxu0 %vm867_vm3, %v1114_v51  ;;  %vm1262_vm6 = vmor %vm81_vm2, %vm129_vm13  ;;  %vm203_vm13 = vcmp.eq.s32.totalorder %v1210_v40, %v179_v52  ;;  %v185_v58 = vpop.permute.xlu0 %184 }
  0xaa   :  { %v1446_v54 = vsel %vm1262_vm6, 4294967295, %v1445_v54  ;;  %vm154_vm11 = vmor %vm82_vm4, %vm130_vm5  ;;  %vm201_vm5 = vcmp.eq.s32.totalorder %v1204_v36, %v179_v52  ;;  %984 = vmatpush3.bf16.msra.mxu0 %v1052_v11 }
  0xab   :  { %vm155_vm12 = vmor %vm83_vm7, %vm131_vm8  ;;  %v110_v55 = vpop.permute.xlu1 %109  ;;  %985 = vmatprep.subr.bf16.mxu0 %v1115_v12 }
  0xac   :  { %vm132_vm14 = vcmp.eq.s32.totalorder %v1204_v36, %v110_v55  ;;  %vm133_vm1 = vcmp.eq.s32.totalorder %v1207_v39, %v110_v55  ;;  %vm134_vm2 = vcmp.eq.s32.totalorder %v1210_v40, %v110_v55  ;;  %vm226_vm3 = vmor %vm154_vm11, %vm202_vm15 }
  0xad   :  { %vm1275_vm6 = vmor %vm84_vm9, %vm132_vm14  ;;  %vm1449_vm9 = vnez %v1446_v54 }
  0xae   :  { %v1448_v56 = vsel %vm1275_vm6, 4294967295, %v1447_v56  ;;  %vm157_vm4 = vmor %vm85_vm10, %vm133_vm1  ;;  %v68_v61 = vpop.permute.xlu0 %67  ;;  %986 = vmatpush3.bf16.msra.mxu0 %v1053_v13 }
  0xaf   :  { %vm158_vm8 = vmor %vm86_vm0, %vm134_vm2  ;;  %987 = vmatprep.subr.bf16.mxu0 %v1115_v12 }
  0xb0   :  { %v182_v57 = vpop.permute.xlu1 %181  ;;  %vm227_vm7 = vmor %vm155_vm12, %vm203_vm13  ;;  %vm1450_vm12 = vnez %v1448_v56 }
  0xb1   :  { %vm205_vm11 = vcmp.eq.s32.totalorder %v1207_v39, %v182_v57  ;;  %vm206_vm15 = vcmp.eq.s32.totalorder %v1210_v40, %v182_v57  ;;  %vm225_vm14 = vmor %vm1449_vm9, %vm201_vm5  ;;  %vm204_vm1 = vcmp.eq.s32.totalorder %v1204_v36, %v182_v57 }
  0xb2   :  { %vm229_vm6 = vmor %vm157_vm4, %vm205_vm11  ;;  %v74_v2 = vpop.permute.xlu0 %73  ;;  %988 = vmatpush3.bf16.msra.mxu0 %v1054_v14 }
  0xb3   :  { %vm869_vm10 = vmpackc.low %vm229_vm6, %vm226_vm3  ;;  %989 = vmatprep.subr.bf16.mxu0 %v1115_v12 }
  0xb4   :  { %870 = vmatprep.mubr.msk.bf16.mxu0 %vm869_vm10, %v1114_v51  ;;  %vm230_vm0 = vmor %vm158_vm8, %vm206_vm15  ;;  %vm208_vm15 = vcmp.eq.s32.totalorder %v1207_v39, %v185_v58 }
  0xb5   :  { %vm883_vm2 = vmpackc.low %vm230_vm0, %vm227_vm7  ;;  %v65_v59 = vpop.permute.xlu1 %64  ;;  %vm91_vm0 = vcmp.eq.s32.totalorder %v1207_v39, %v68_v61 }
  0xb6   :  { %976 = vmatmul.mubr.msk.bf16.vlgmr.msra.gmra.mrb[0].mxu1 %vm883_vm2, %v1114_v51  ;;  %vm228_vm13 = vmor %vm1450_vm12, %vm204_vm1  ;;  %vm87_vm4 = vcmp.eq.s32.totalorder %v1204_v36, %v65_v59  ;;  %vm88_vm7 = vcmp.eq.s32.totalorder %v1207_v39, %v65_v59  ;;  %vm89_vm9 = vcmp.eq.s32.totalorder %v1210_v40, %v65_v59  ;;  %vm90_vm1 = vcmp.eq.s32.totalorder %v1204_v36, %v68_v61 }
  0xb7   :  { %vm871_vm5 = vmpackc.low %vm228_vm13, %vm225_vm14  ;;  %v191_v5 = vpop.permute.xlu0 %190  ;;  %990 = vmatpush3.bf16.msra.mxu0 %v1055_v15 }
  0xb8   :  { %872 = vmatmul.mubr.msk.bf16.gmra.mrb[4].mxu0 %vm871_vm5, %v1114_v51  ;;  %vm92_vm5 = vcmp.eq.s32.totalorder %v1210_v40, %v68_v61  ;;  %991 = vmatprep.subr.bf16.mxu0 %v1115_v12 }
  0xba   :  { %v113_v60 = vpop.permute.xlu1 %112 }
  0xbb   :  { %vm135_vm6 = vcmp.eq.s32.totalorder %v1204_v36, %v113_v60  ;;  %vm136_vm3 = vcmp.eq.s32.totalorder %v1207_v39, %v113_v60  ;;  %vm137_vm8 = vcmp.eq.s32.totalorder %v1210_v40, %v113_v60  ;;  %992 = vmatpush3.bf16.msra.mxu0 %v1056_v16 }
  0xbc   :  { %vm1295_vm11 = vmor %vm87_vm4, %vm135_vm6  ;;  %vm209_vm6 = vcmp.eq.s32.totalorder %v1210_v40, %v185_v58  ;;  %993 = vmatprep.subr.bf16.mxu0 %v1115_v12 }
  0xbd   :  { %v1452_v62 = vsel %vm1295_vm11, 4294967295, %v1451_v62  ;;  %vm160_vm14 = vmor %vm88_vm7, %vm136_vm3  ;;  %vm207_vm3 = vcmp.eq.s32.totalorder %v1204_v36, %v185_v58 }
  0xbe   :  { %vm161_vm10 = vmor %vm89_vm9, %vm137_vm8  ;;  %v116_v63 = vpop.permute.xlu1 %115 }
  0xbf   :  { %vm138_vm2 = vcmp.eq.s32.totalorder %v1204_v36, %v116_v63  ;;  %vm139_vm12 = vcmp.eq.s32.totalorder %v1207_v39, %v116_v63  ;;  %vm140_vm13 = vcmp.eq.s32.totalorder %v1210_v40, %v116_v63  ;;  %vm232_vm4 = vmor %vm160_vm14, %vm208_vm15  ;;  %994 = vmatpush3.bf16.msra.mxu0 %v1057_v17 }
  0xc0   :  { %vm1308_vm11 = vmor %vm90_vm1, %vm138_vm2  ;;  %vm1455_vm1 = vnez %v1452_v62  ;;  %995 = vmatprep.subr.bf16.mxu0 %v1115_v12 }
  0xc1   :  { %v1454_v0 = vsel %vm1308_vm11, 4294967295, %v1453_v0  ;;  %vm163_vm8 = vmor %vm91_vm0, %vm139_vm12 }
  0xc2   :  { %vm164_vm7 = vmor %vm92_vm5, %vm140_vm13 }
  0xc3   :  { %v188_v1 = vpop.permute.xlu1 %187  ;;  %vm233_vm9 = vmor %vm161_vm10, %vm209_vm6  ;;  %vm1456_vm10 = vnez %v1454_v0  ;;  %996 = vmatpush3.bf16.msra.mxu0 %v1058_v18 }
  0xc4   :  { %vm211_vm14 = vcmp.eq.s32.totalorder %v1207_v39, %v188_v1  ;;  %vm212_vm15 = vcmp.eq.s32.totalorder %v1210_v40, %v188_v1  ;;  %vm231_vm2 = vmor %vm1455_vm1, %vm207_vm3  ;;  %vm210_vm0 = vcmp.eq.s32.totalorder %v1204_v36, %v188_v1  ;;  %997 = vmatprep.subr.bf16.mxu0 %v1115_v12 }
  0xc5   :  { %vm235_vm11 = vmor %vm163_vm8, %vm211_vm14 }
  0xc6   :  { %vm873_vm12 = vmpackc.low %vm235_vm11, %vm232_vm4 }
  0xc7   :  { %874 = vmatprep.mubr.msk.bf16.mxu0 %vm873_vm12, %v1114_v51  ;;  %vm236_vm5 = vmor %vm164_vm7, %vm212_vm15  ;;  %vm213_vm12 = vcmp.eq.s32.totalorder %v1204_v36, %v191_v5  ;;  %998 = vmatpush3.bf16.msra.mxu0 %v1059_v19 }
  0xc8   :  { %vm885_vm13 = vmpackc.low %vm236_vm5, %vm233_vm9  ;;  %v71_v3 = vpop.permute.xlu1 %70  ;;  %vm215_vm5 = vcmp.eq.s32.totalorder %v1210_v40, %v191_v5 }
  0xc9   :  { %979 = vmatprep.mubr.msk.bf16.mxu1 %vm885_vm13, %v1114_v51  ;;  %vm234_vm6 = vmor %vm1456_vm10, %vm210_vm0  ;;  %vm93_vm3 = vcmp.eq.s32.totalorder %v1204_v36, %v71_v3  ;;  %vm94_vm7 = vcmp.eq.s32.totalorder %v1207_v39, %v71_v3  ;;  %vm95_vm14 = vcmp.eq.s32.totalorder %v1210_v40, %v71_v3 }
  0xca   :  { %vm875_vm1 = vmpackc.low %vm234_vm6, %vm231_vm2  ;;  %vm214_vm2 = vcmp.eq.s32.totalorder %v1207_v39, %v191_v5 }
  0xcb   :  { %876 = vmatmul.mubr.msk.bf16.gmra.mrb[8].mxu0 %vm875_vm1, %v1114_v51  ;;  %vm96_vm1 = vcmp.eq.s32.totalorder %v1204_v36, %v74_v2 }
  0xcd   :  { %v119_v4 = vpop.permute.xlu1 %118 }
  0xce   :  { %vm141_vm11 = vcmp.eq.s32.totalorder %v1204_v36, %v119_v4  ;;  %vm142_vm4 = vcmp.eq.s32.totalorder %v1207_v39, %v119_v4  ;;  %vm143_vm8 = vcmp.eq.s32.totalorder %v1210_v40, %v119_v4 }
  0xcf   :  { %vm165_vm9 = vmor %vm93_vm3, %vm141_vm11 }
  0xd0   :  { %vm166_vm15 = vmor %vm94_vm7, %vm142_vm4 }
  0xd1   :  { %vm167_vm0 = vmor %vm95_vm14, %vm143_vm8  ;;  %v122_v6 = vpop.permute.xlu1 %121  ;;  %vm97_vm8 = vcmp.eq.s32.totalorder %v1207_v39, %v74_v2  ;;  %vm98_vm14 = vcmp.eq.s32.totalorder %v1210_v40, %v74_v2 }
  0xd2   :  { %vm144_vm13 = vcmp.eq.s32.totalorder %v1204_v36, %v122_v6  ;;  %vm1333_vm10 = vmor %vm166_vm15, %vm214_vm2  ;;  %vm145_vm6 = vcmp.eq.s32.totalorder %v1207_v39, %v122_v6  ;;  %vm146_vm4 = vcmp.eq.s32.totalorder %v1210_v40, %v122_v6 }
  0xd3   :  { %v1458_v7 = vsel %vm1333_vm10, 4294967295, %v1457_v7  ;;  %vm1339_vm3 = vmor %vm165_vm9, %vm213_vm12 }
  0xd4   :  { %v1460_v8 = vsel %vm1339_vm3, 4294967295, %v1459_v8  ;;  %vm1343_vm11 = vmor %vm167_vm0, %vm215_vm5 }
  0xd5   :  { %v1462_v9 = vsel %vm1343_vm11, 4294967295, %v1461_v9  ;;  %vm168_vm7 = vmor %vm96_vm1, %vm144_vm13  ;;  %vm1463_vm11 = vnez %v1458_v7 }
  0xd6   :  { %v194_v10 = vpop.permute.xlu1 %193  ;;  %vm169_vm15 = vmor %vm97_vm8, %vm145_vm6  ;;  %vm1464_vm13 = vnez %v1462_v9 }
  0xd7   :  { %vm170_vm2 = vmor %vm98_vm14, %vm146_vm4  ;;  %vm216_vm10 = vcmp.eq.s32.totalorder %v1204_v36, %v194_v10  ;;  %vm217_vm9 = vcmp.eq.s32.totalorder %v1207_v39, %v194_v10  ;;  %vm218_vm12 = vcmp.eq.s32.totalorder %v1210_v40, %v194_v10  ;;  %vm1465_vm4 = vnez %v1460_v8 }
  0xd8   :  { %vm240_vm0 = vmor %vm168_vm7, %vm216_vm10  ;;  %vm1116_vm10 = vmmov 0   ;;  %vm724_vm7 = vcmask 1043459   ;;  %vm726_vm14 = vcmask 1044484  }
  0xd9   :  { %vm241_vm5 = vmor %vm169_vm15, %vm217_vm9  ;;  %vm728_vm15 = vcmask 1045509   ;;  %vm732_vm9 = vcmask 1047559  }
  0xda   :  { %vm242_vm3 = vmor %vm170_vm2, %vm218_vm12  ;;  %vm730_vm2 = vcmask 1046534  }
  0xdb   :  { %vm877_vm1 = vmpackc.low %vm241_vm5, %vm1463_vm11  ;;  %vm722_vm11 = vcmask 1042434  }
  0xdc   :  { %878 = vmatprep.mubr.msk.bf16.mxu0 %vm877_vm1, %v1114_v51  ;;  %vm887_vm6 = vmpackc.low %vm242_vm3, %vm1464_vm13  ;;  %vm720_vm3 = vcmask 1041409  }
  0xdd   :  { %980 = vmatmul.mubr.msk.bf16.gmra.mrb[4].mxu1 %vm887_vm6, %v1114_v51  ;;  %vm879_vm8 = vmpackc.low %vm240_vm0, %vm1465_vm4 }
  0xde   :  { %880 = vmatmul.mubr.msk.bf16.gmra.mrb[12].mxu0 %vm879_vm8, %v1114_v51 }
  0xdf   :  { %999 = vmatprep.mubr.msk.bf16.mxu0 %vm1116_vm10, %v1115_v12 }
 0x17c   :  { %v914_v20 = vpop.f32.mrb[0].mxu0 }
 0x17d   :  { %v915_v21 = vpop.f32.mrb[1].mxu0 }
 0x17e   :  { %v916_v22 = vadd.f32 %v915_v21, %v914_v20  ;;  %v917_v23 = vpop.f32.mrb[2].mxu0 }
 0x17f   :  { %v918_v24 = vpop.f32.mrb[3].mxu0 }
 0x180   :  { %v919_v25 = vadd.f32 %v918_v24, %v917_v23  ;;  %v513_v28 = vadd.f32 %v916_v22, %v1389_v26 }
 0x182   :  { %v516_v33 = vadd.f32 %v919_v25, %v1389_v26 }
 0x189   :  { %v977_v27 = vpop.f32.mrb[0].mxu1 }
 0x18a   :  { %v577_v29 = vpop.f32.mrb[1].mxu1 }
 0x18b   :  { %v920_v30 = vpop.f32.mrb[4].mxu0  ;;  %v578_v31 = vadd.f32 %v577_v29, %v513_v28  ;;  %v978_v32 = vpop.f32.mrb[2].mxu1 }
 0x18c   :  { %v921_v35 = vpop.f32.mrb[5].mxu0  ;;  %v580_v36 = vpop.f32.mrb[3].mxu1 }
 0x18d   :  { %v608_v37 = vmax.f32 %v578_v31, 0.0  ;;  %v922_v38 = vadd.f32 %v921_v35, %v920_v30  ;;  %v923_v39 = vpop.f32.mrb[6].mxu0  ;;  %v581_v40 = vadd.f32 %v580_v36, %v516_v33 }
 0x18e   :  { %v924_v41 = vpop.f32.mrb[7].mxu0 }
 0x18f   :  { %v617_v42 = vmul.f32 %v1396_v34, %v608_v37  ;;  %v521_v43 = vadd.f32 %v922_v38, %v1389_v26  ;;  %v609_v44 = vmax.f32 %v581_v40, 0.0  ;;  %v925_v45 = vadd.f32 %v924_v41, %v923_v39 }
 0x191   :  { %v625_v46 = vrot.slane %v617_v42, 4  ;;  %v586_v47 = vadd.f32 %v977_v27, %v521_v43  ;;  %v618_v48 = vmul.f32 %v1396_v34, %v609_v44  ;;  %v524_v49 = vadd.f32 %v925_v45, %v1389_v26 }
 0x193   :  { %v626_v50 = vmax.f32 %v617_v42, %v625_v46  ;;  %v610_v51 = vmax.f32 %v586_v47, 0.0  ;;  %v631_v52 = vrot.slane %v618_v48, 4  ;;  %v589_v53 = vadd.f32 %v978_v32, %v524_v49 }
 0x195   :  { %v627_v54 = vrot.slane %v626_v50, 2  ;;  %v619_v55 = vmul.f32 %v1396_v34, %v610_v51  ;;  %v632_v56 = vmax.f32 %v618_v48, %v631_v52  ;;  %v611_v57 = vmax.f32 %v589_v53, 0.0 }
 0x197   :  { %v628_v58 = vmax.f32 %v626_v50, %v627_v54  ;;  %v637_v59 = vrot.slane %v619_v55, 4  ;;  %v633_v60 = vrot.slane %v632_v56, 2  ;;  %v620_v61 = vmul.f32 %v1396_v34, %v611_v57 }
 0x199   :  { %v629_v62 = vrot.slane %v628_v58, 1  ;;  %v638_v63 = vmax.f32 %v619_v55, %v637_v59  ;;  %v634_v0 = vmax.f32 %v632_v56, %v633_v60  ;;  %v643_v1 = vrot.slane %v620_v61, 4 }
 0x19b   :  { %v630_v2 = vmax.f32 %v628_v58, %v629_v62  ;;  %v639_v3 = vrot.slane %v638_v63, 2  ;;  %v635_v4 = vrot.slane %v634_v0, 1  ;;  %v644_v5 = vmax.f32 %v620_v61, %v643_v1 }
 0x19d   :  { %v673_v6 = vpack.c.bf16 %v630_v2, %v630_v2  ;;  %v640_v7 = vmax.f32 %v638_v63, %v639_v3  ;;  %v636_v8 = vmax.f32 %v634_v0, %v635_v4  ;;  %v645_v9 = vrot.slane %v644_v5, 2 }
 0x19e   :  { %v926_v10 = vpop.f32.mrb[8].mxu0 }
 0x19f   :  { %v641_v11 = vrot.slane %v640_v7, 1  ;;  %v674_v12 = vpack.c.bf16 %v636_v8, %v636_v8  ;;  %v646_v13 = vmax.f32 %v644_v5, %v645_v9  ;;  %v927_v14 = vpop.f32.mrb[9].mxu0  ;;  %v712_v17 = vunpack.c.l.b16 %v673_v6 }
 0x1a0   :  { %v928_v15 = vadd.f32 %v927_v14, %v926_v10  ;;  %v929_v16 = vpop.f32.mrb[10].mxu0 }
 0x1a1   :  { %v642_v18 = vmax.f32 %v640_v7, %v641_v11  ;;  %v713_v19 = vunpack.c.l.b16 %v674_v12  ;;  %v647_v20 = vrot.slane %v646_v13, 1  ;;  %v930_v21 = vpop.f32.mrb[11].mxu0 }
 0x1a2   :  { %v931_v22 = vadd.f32 %v930_v21, %v929_v16  ;;  %v529_v33 = vadd.f32 %v928_v15, %v1389_v26 }
 0x1a3   :  { %v675_v23 = vpack.c.bf16 %v642_v18, %v642_v18  ;;  %v721_v24 = vsel %vm720_vm3, %v713_v19, %v712_v17  ;;  %v648_v25 = vmax.f32 %v646_v13, %v647_v20 }
 0x1a4   :  { %v532_v40 = vadd.f32 %v931_v22, %v1389_v26 }
 0x1a5   :  { %v714_v27 = vunpack.c.l.b16 %v675_v23  ;;  %v676_v28 = vpack.c.bf16 %v648_v25, %v648_v25 }
 0x1a7   :  { %v723_v29 = vsel %vm722_vm11, %v714_v27, %v721_v24  ;;  %v715_v30 = vunpack.c.l.b16 %v676_v28 }
 0x1a9   :  { %v725_v31 = vsel %vm724_vm7, %v715_v30, %v723_v29 }
 0x1b0   :  { %v981_v32 = vpop.f32.mrb[4].mxu1 }
 0x1b1   :  { %v932_v35 = vpop.f32.mrb[12].mxu0  ;;  %v593_v36 = vpop.f32.mrb[5].mxu1 }
 0x1b2   :  { %v594_v37 = vadd.f32 %v593_v36, %v529_v33  ;;  %v933_v38 = vpop.f32.mrb[13].mxu0  ;;  %v982_v39 = vpop.f32.mrb[6].mxu1 }
 0x1b3   :  { %v934_v41 = vadd.f32 %v933_v38, %v932_v35  ;;  %v935_v42 = vpop.f32.mrb[14].mxu0  ;;  %v596_v43 = vpop.f32.mrb[7].mxu1 }
 0x1b4   :  { %v612_v44 = vmax.f32 %v594_v37, 0.0  ;;  %v597_v45 = vadd.f32 %v596_v43, %v532_v40  ;;  %v936_v46 = vpop.f32.mrb[15].mxu0 }
 0x1b5   :  { %v537_v47 = vadd.f32 %v934_v41, %v1389_v26  ;;  %v937_v48 = vadd.f32 %v936_v46, %v935_v42 }
 0x1b6   :  { %v621_v49 = vmul.f32 %v1396_v34, %v612_v44  ;;  %v613_v50 = vmax.f32 %v597_v45, 0.0 }
 0x1b7   :  { %v602_v51 = vadd.f32 %v981_v32, %v537_v47  ;;  %v540_v52 = vadd.f32 %v937_v48, %v1389_v26  ;;  %v889_v32 = vld [vmem:[%s1432_s5] ss:$0 sm:$0xff] }
 0x1b8   :  { %v649_v53 = vrot.slane %v621_v49, 4  ;;  %v622_v54 = vmul.f32 %v1396_v34, %v613_v50 }
 0x1b9   :  { %v614_v55 = vmax.f32 %v602_v51, 0.0  ;;  %v605_v56 = vadd.f32 %v982_v39, %v540_v52 }
 0x1ba   :  { %v650_v57 = vmax.f32 %v621_v49, %v649_v53  ;;  %v655_v58 = vrot.slane %v622_v54, 4 }
 0x1bb   :  { %v623_v59 = vmul.f32 %v1396_v34, %v614_v55  ;;  %v615_v60 = vmax.f32 %v605_v56, 0.0 }
 0x1bc   :  { %v651_v61 = vrot.slane %v650_v57, 2  ;;  %v656_v62 = vmax.f32 %v622_v54, %v655_v58 }
 0x1bd   :  { %v661_v63 = vrot.slane %v623_v59, 4  ;;  %v624_v0 = vmul.f32 %v1396_v34, %v615_v60 }
 0x1be   :  { %v652_v1 = vmax.f32 %v650_v57, %v651_v61  ;;  %v657_v2 = vrot.slane %v656_v62, 2 }
 0x1bf   :  { %v662_v3 = vmax.f32 %v623_v59, %v661_v63  ;;  %v667_v4 = vrot.slane %v624_v0, 4 }
 0x1c0   :  { %v653_v26 = vrot.slane %v652_v1, 1  ;;  %v658_v5 = vmax.f32 %v656_v62, %v657_v2 }
 0x1c1   :  { %v663_v6 = vrot.slane %v662_v3, 2  ;;  %v668_v7 = vmax.f32 %v624_v0, %v667_v4 }
 0x1c2   :  { %v654_v8 = vmax.f32 %v652_v1, %v653_v26  ;;  %v659_v9 = vrot.slane %v658_v5, 1 }
 0x1c3   :  { %v664_v10 = vmax.f32 %v662_v3, %v663_v6  ;;  %v669_v11 = vrot.slane %v668_v7, 2 }
 0x1c4   :  { %v677_v12 = vpack.c.bf16 %v654_v8, %v654_v8  ;;  %v660_v13 = vmax.f32 %v658_v5, %v659_v9 }
 0x1c5   :  { %v665_v14 = vrot.slane %v664_v10, 1  ;;  %v670_v15 = vmax.f32 %v668_v7, %v669_v11 }
 0x1c6   :  { %v716_v16 = vunpack.c.l.b16 %v677_v12  ;;  %v678_v17 = vpack.c.bf16 %v660_v13, %v660_v13 }
 0x1c7   :  { %v666_v34 = vmax.f32 %v664_v10, %v665_v14  ;;  %v671_v18 = vrot.slane %v670_v15, 1 }
 0x1c8   :  { %v727_v19 = vsel %vm726_vm14, %v716_v16, %v725_v31  ;;  %v717_v20 = vunpack.c.l.b16 %v678_v17 }
 0x1c9   :  { %v679_v21 = vpack.c.bf16 %v666_v34, %v666_v34  ;;  %v672_v22 = vmax.f32 %v670_v15, %v671_v18 }
 0x1ca   :  { %v729_v23 = vsel %vm728_vm15, %v717_v20, %v727_v19 }
 0x1cb   :  { %v718_v24 = vunpack.c.l.b16 %v679_v21  ;;  %v680_v25 = vpack.c.bf16 %v672_v22, %v672_v22 }
 0x1cd   :  { %v719_v27 = vunpack.c.l.b16 %v680_v25  ;;  %v731_v28 = vsel %vm730_vm2, %v718_v24, %v729_v23 }
 0x1cf   :  { %v733_v29 = vsel %vm732_vm9, %v719_v27, %v731_v28 }
 0x1d0   :  { %v734_v30 = vpack.c.b16 %v733_v29, %v733_v29 }
 0x1d2   :  { %1000 = vmatmul.mubr.bf16.vlgmr.msra.gmra.mrb[16].mxu0 %v734_v30 }
 0x2a5   :  { %v818_v31 = vpop.f32.mrb[16].mxu0 }
 0x2a6   :  { %v819_v33 = vadd.f32 %v889_v32, %v818_v31  ;;  %v1001_v35 = vpop.f32.mrb[17].mxu0 }
 0x2a7   :  { %v821_v36 = vpop.f32.mrb[18].mxu0 }
 0x2a8   :  { %824 = vst [vmem:[#allocation5] sm:$0xff] %v819_v33  ;;  %v1002_v37 = vpop.f32.mrb[19].mxu0 }
 0x2a9   :  { %1093 = shalt.err (!%p1090_p12)
}
 0x2aa   :  { %s1094_s5 = scalar_lea.hbm %s1433_s6, 128 }
 0x2ab   :  { %p1095_p13 = scmp.ne.s32.totalorder %s1433_s6, %s1094_s5  ;;  %p1098_p0 = scmp.lt.u32.totalorder %s1094_s5, %s1433_s6 }
 0x2ad   :  { %p1100_p1 = pnand %p1098_p0, %p1095_p13 }
 0x2af   :  { %1103 = shalt.err (!%p1100_p1)
}
 0x2b0   :  { %834 = dma.vmem_to_hbm [thread:$0]  %s832_s20, 128, %s1433_s6, [#allocation4]  }
 0x2b1   :  { %1106 = dma.done.wait [#allocation4], 128  }
 0x2b2   :  { %1107 = vsyncadd [#allocation4], 4294967168 }
 0x2b3   :  { %838 = vsyncpa [#allocation3], 1 }
 0x2b4   :  { %839 = vsyncpa [#allocation4], 1 }

</bundles_post_ra>
